<compile_context>
chip_gen: v7x
topology: tpu7x:2x2x1
jax: 0.10.0
libtpu: 0.0.40
codegen_flags: <defaults>
</compile_context>

<pallas_src>
import functools

import jax
import jax.numpy as jnp
from jax.experimental import pallas as pl
from jax.experimental.pallas import tpu as pltpu

INPUT_DIM = 784
HIDDEN_DIM = 400
Z_DIM = 20

HIDDEN_PAD = 512          # 400 -> 512: clean (8,128) tiling for h / K of 2nd matmul
OUT_PAD = 128             # packed output slab: mu@[0:20), z@[32:52), logvar@[64:84)
MU_OFF = 0
Z_OFF = 32
LV_OFF = 64
W2_WIDTH = 2 * OUT_PAD    # lanes [128:256) carry logvar aligned under the z lanes


def _round_up(n, m):
    return ((n + m - 1) // m) * m


def _choose_tb(batch, block_b):
    """Largest tile <= block_b, rows a multiple of 8, >=2 grid steps when possible."""
    tb = _round_up(max(-(-batch // 2), 8), 8)     # ceil(B/2), >= 8, multiple of 8
    return max(8, min(block_b, tb))


# ----------------------------- Pallas kernel --------------------------------

def encoder_kernel(x_ref, w1_ref, b1_ref, w2_ref, b2_ref, eps_ref, out_ref):
    # fc1 + ReLU: x cast to bf16 in-VMEM (no separate HBM convert pass),
    # f32 accumulation on the MXU, bias/ReLU in f32.
    h = jnp.dot(x_ref[...].astype(jnp.bfloat16), w1_ref[...],
                preferred_element_type=jnp.float32)
    h = jnp.maximum(h + b1_ref[...], 0.0)

    # One fused matmul produces a (TB, 256) f32 slab:
    #   lanes [0:128)  : mu@[0:20), mu-dup@[32:52), logvar@[64:84)   (output layout)
    #   lanes [128:256): logvar@[32:52), exact zeros elsewhere       (z-aligned copy)
    yy = jnp.dot(h.astype(jnp.bfloat16), w2_ref[...],
                 preferred_element_type=jnp.float32) + b2_ref[...]
    y = yy[:, :OUT_PAD]               # 128-aligned static slices: no relayout
    lv_aligned = yy[:, OUT_PAD:]

    # Fused reparameterize on lanes [32:52): z = mu + eps * exp(0.5 * logvar).
    # lv_aligned is exactly 0 outside those lanes, so exp() cannot overflow there.
    lane = jax.lax.broadcasted_iota(jnp.int32, y.shape, 1)
    z_mask = (lane >= Z_OFF) & (lane < Z_OFF + Z_DIM)
    std = jnp.exp(0.5 * lv_aligned)
    out_ref[...] = jnp.where(z_mask,
                             y + eps_ref[...].astype(jnp.float32) * std,
                             y)


# ------------------------------ Host wrapper ---------------------------------

@functools.partial(jax.jit, static_argnames=("block_b",))
def encoder_apply(params, x, eps, *, block_b=512):
    """Fused Encoder.forward + reparameterize.

    x   : (B, 784) f32
    eps : (B, 128) noise slab (bf16/f32); lanes [32:52) are the eps actually used.
    Returns (mu, logvar, z), each (B, 20) f32.
    """
    B = x.shape[0]
    tb = _choose_tb(B, block_b)
    grid = (pl.cdiv(B, tb),)                       # ragged last block handled by Pallas

    resident = lambda i: (0, 0)                    # weights/biases stay VMEM-resident
    batch_tile = lambda i: (i, 0)

    flops = 2 * B * (INPUT_DIM * HIDDEN_PAD + HIDDEN_PAD * W2_WIDTH)
    bytes_accessed = (B * (INPUT_DIM * 4 + OUT_PAD * eps.dtype.itemsize + OUT_PAD * 4)
                      + INPUT_DIM * HIDDEN_PAD * 2 + HIDDEN_PAD * W2_WIDTH * 2
                      + HIDDEN_PAD * 4 + W2_WIDTH * 4)

    out = pl.pallas_call(
        encoder_kernel,
        out_shape=jax.ShapeDtypeStruct((B, OUT_PAD), jnp.float32),
        grid=grid,
        in_specs=[
            pl.BlockSpec((tb, INPUT_DIM), batch_tile),          # x (f32, cast in-kernel)
            pl.BlockSpec((INPUT_DIM, HIDDEN_PAD), resident),    # w1 (bf16)
            pl.BlockSpec((1, HIDDEN_PAD), resident),            # b1 (f32)
            pl.BlockSpec((HIDDEN_PAD, W2_WIDTH), resident),     # w2 packed (bf16)
            pl.BlockSpec((1, W2_WIDTH), resident),              # b2 packed (f32)
            pl.BlockSpec((tb, OUT_PAD), batch_tile),            # eps noise slab
        ],
        out_specs=pl.BlockSpec((tb, OUT_PAD), batch_tile),
        compiler_params=pltpu.CompilerParams(
            dimension_semantics=("parallel",),
        ),
        cost_estimate=pl.CostEstimate(
            flops=flops, transcendentals=B * OUT_PAD, bytes_accessed=bytes_accessed),
    )(x, params["w1"], params["b1"], params["w2"], params["b2"], eps)

    mu = out[:, MU_OFF:MU_OFF + Z_DIM]
    z = out[:, Z_OFF:Z_OFF + Z_DIM]
    logvar = out[:, LV_OFF:LV_OFF + Z_DIM]
    return mu, logvar, z


# ------------------------ deterministic parameter init ----------------------

def init_params(key):
    """PyTorch nn.Linear-style init, packed/padded for the fused kernel."""
    ks = jax.random.split(key, 6)

    def lin(kw, kb, fan_in, fan_out):
        bound = float(fan_in) ** -0.5
        w = jax.random.uniform(kw, (fan_in, fan_out), jnp.float32, -bound, bound)
        b = jax.random.uniform(kb, (fan_out,), jnp.float32, -bound, bound)
        return w, b

    w1, b1 = lin(ks[0], ks[1], INPUT_DIM, HIDDEN_DIM)
    w_mu, b_mu = lin(ks[2], ks[3], HIDDEN_DIM, Z_DIM)
    w_lv, b_lv = lin(ks[4], ks[5], HIDDEN_DIM, Z_DIM)

    # Zero-pad hidden 400 -> 512.
    w1_p = jnp.zeros((INPUT_DIM, HIDDEN_PAD), jnp.float32).at[:, :HIDDEN_DIM].set(w1)
    b1_p = jnp.zeros((1, HIDDEN_PAD), jnp.float32).at[:, :HIDDEN_DIM].set(b1)

    # Pack fc2_mu / fc2_logvar into one (512, 256) weight:
    #   cols [0:20)    mu          cols [32:52)   mu (base for z lanes)
    #   cols [64:84)   logvar      cols [160:180) logvar (aligned under z lanes)
    w2_p = jnp.zeros((HIDDEN_PAD, W2_WIDTH), jnp.float32)
    w2_p = w2_p.at[:HIDDEN_DIM, MU_OFF:MU_OFF + Z_DIM].set(w_mu)
    w2_p = w2_p.at[:HIDDEN_DIM, Z_OFF:Z_OFF + Z_DIM].set(w_mu)
    w2_p = w2_p.at[:HIDDEN_DIM, LV_OFF:LV_OFF + Z_DIM].set(w_lv)
    w2_p = w2_p.at[:HIDDEN_DIM, OUT_PAD + Z_OFF:OUT_PAD + Z_OFF + Z_DIM].set(w_lv)

    b2_p = jnp.zeros((1, W2_WIDTH), jnp.float32)
    b2_p = b2_p.at[:, MU_OFF:MU_OFF + Z_DIM].set(b_mu)
    b2_p = b2_p.at[:, Z_OFF:Z_OFF + Z_DIM].set(b_mu)
    b2_p = b2_p.at[:, LV_OFF:LV_OFF + Z_DIM].set(b_lv)
    b2_p = b2_p.at[:, OUT_PAD + Z_OFF:OUT_PAD + Z_OFF + Z_DIM].set(b_lv)

    return {
        "w1": w1_p.astype(jnp.bfloat16),   # bf16 weights: half the resident HBM traffic
        "b1": b1_p,                        # biases stay f32 (added after f32 accumulation)
        "w2": w2_p.astype(jnp.bfloat16),
        "b2": b2_p,
    }


# ------------------------------ plain-JAX reference --------------------------

def reference(params, x, eps_slab):
    xb = x.astype(jnp.bfloat16)
    h = jnp.maximum(
        jnp.dot(xb, params["w1"], preferred_element_type=jnp.float32) + params["b1"],
        0.0)
    y = jnp.dot(h.astype(jnp.bfloat16), params["w2"],
                preferred_element_type=jnp.float32) + params["b2"]
    mu = y[:, MU_OFF:MU_OFF + Z_DIM]
    logvar = y[:, LV_OFF:LV_OFF + Z_DIM]
    eps = eps_slab[:, Z_OFF:Z_OFF + Z_DIM].astype(jnp.float32)
    z = mu + eps * jnp.exp(0.5 * logvar)
    return mu, logvar, z


# --------------------------------- main --------------------------------------

if __name__ == "__main__":
    root = jax.random.PRNGKey(0)
    k_params, k_x, k_eps = jax.random.split(root, 3)
    params = init_params(k_params)

    # batch=2: tiny demo; batch=300: exercises a multi-step grid + ragged last block.
    for batch in (2, 300):
        kx = jax.random.fold_in(k_x, batch)
        ke = jax.random.fold_in(k_eps, batch)
        x = jax.random.normal(kx, (batch, INPUT_DIM), dtype=jnp.float32)
        # Noise slab generated directly at kernel width (no host-side pad/scatter pass);
        # lanes [32:52) are the eps consumed by reparameterize.
        eps = jax.random.normal(ke, (batch, OUT_PAD), dtype=jnp.bfloat16)

        mu, logvar, z = encoder_apply(params, x, eps)
        jax.block_until_ready((mu, logvar, z))

        mu_r, lv_r, z_r = reference(params, x, eps)
        assert jnp.allclose(mu, mu_r, atol=5e-3, rtol=5e-3), "mu mismatch"
        assert jnp.allclose(logvar, lv_r, atol=5e-3, rtol=5e-3), "logvar mismatch"
        assert jnp.allclose(z, z_r, atol=5e-3, rtol=5e-3), "z mismatch"

    print("KERNEL_OK")
</pallas_src>

<mosaic_0001>
module attributes {stable_mosaic.version = 11 : i64} {
  func.func @encoder_kernel(%arg0: i32, %arg1: memref<8x784xf32, #tpu.memory_space<vmem>>, %arg2: memref<784x512xbf16, #tpu.memory_space<vmem>>, %arg3: memref<1x512xf32, #tpu.memory_space<vmem>>, %arg4: memref<512x256xbf16, #tpu.memory_space<vmem>>, %arg5: memref<1x256xf32, #tpu.memory_space<vmem>>, %arg6: memref<8x128xbf16, #tpu.memory_space<vmem>>, %arg7: memref<8x128xf32, #tpu.memory_space<vmem>>) attributes {dimension_semantics = [#tpu.dimension_semantics<parallel>], iteration_bounds = array<i64: 1>, scalar_prefetch = 0 : i64, scratch_operands = 0 : i64, tpu.core_type = #tpu.core_type<tc>, window_params = [{transform_indices = @transform_0, window_bounds = array<i64: 8, 784>}, {pipeline_mode = #tpu.pipeline_mode<synchronous>, transform_indices = @transform_1, window_bounds = array<i64: 784, 512>}, {pipeline_mode = #tpu.pipeline_mode<synchronous>, transform_indices = @transform_2, window_bounds = array<i64: 1, 512>}, {pipeline_mode = #tpu.pipeline_mode<synchronous>, transform_indices = @transform_3, window_bounds = array<i64: 512, 256>}, {pipeline_mode = #tpu.pipeline_mode<synchronous>, transform_indices = @transform_4, window_bounds = array<i64: 1, 256>}, {transform_indices = @transform_5, window_bounds = array<i64: 8, 128>}, {transform_indices = @transform_6, window_bounds = array<i64: 8, 128>}]} {
    %c0 = arith.constant 0 : index
    %c0_0 = arith.constant 0 : index
    %0 = vector.load %arg1[%c0, %c0_0] : memref<8x784xf32, #tpu.memory_space<vmem>>, vector<8x784xf32>
    %1 = arith.truncf %0 : vector<8x784xf32> to vector<8x784xbf16>
    %c0_1 = arith.constant 0 : index
    %c0_2 = arith.constant 0 : index
    %2 = vector.load %arg2[%c0_1, %c0_2] : memref<784x512xbf16, #tpu.memory_space<vmem>>, vector<784x512xbf16>
    %cst = arith.constant dense<0.000000e+00> : vector<8x512xf32>
    %3 = tpu.matmul %1, %2, %cst {dimension_numbers = #tpu.dot_dimension_numbers<[1], [0], [0], [1], [0, 0, 1, 1], [], []>} : vector<8x784xbf16>, vector<784x512xbf16>, vector<8x512xf32> -> vector<8x512xf32>
    %c0_3 = arith.constant 0 : index
    %c0_4 = arith.constant 0 : index
    %4 = vector.load %arg3[%c0_3, %c0_4] : memref<1x512xf32, #tpu.memory_space<vmem>>, vector<1x512xf32>
    %5 = vector.broadcast %4 : vector<1x512xf32> to vector<8x512xf32>
    %6 = arith.addf %3, %5 : vector<8x512xf32>
    %cst_5 = arith.constant 0.000000e+00 : f32
    %7 = vector.broadcast %cst_5 : f32 to vector<8x512xf32>
    %8 = arith.maximumf %6, %7 : vector<8x512xf32>
    %9 = arith.truncf %8 : vector<8x512xf32> to vector<8x512xbf16>
    %c0_6 = arith.constant 0 : index
    %c0_7 = arith.constant 0 : index
    %10 = vector.load %arg4[%c0_6, %c0_7] : memref<512x256xbf16, #tpu.memory_space<vmem>>, vector<512x256xbf16>
    %cst_8 = arith.constant dense<0.000000e+00> : vector<8x256xf32>
    %11 = tpu.matmul %9, %10, %cst_8 {dimension_numbers = #tpu.dot_dimension_numbers<[1], [0], [0], [1], [0, 0, 1, 1], [], []>} : vector<8x512xbf16>, vector<512x256xbf16>, vector<8x256xf32> -> vector<8x256xf32>
    %c0_9 = arith.constant 0 : index
    %c0_10 = arith.constant 0 : index
    %12 = vector.load %arg5[%c0_9, %c0_10] : memref<1x256xf32, #tpu.memory_space<vmem>>, vector<1x256xf32>
    %13 = vector.broadcast %12 : vector<1x256xf32> to vector<8x256xf32>
    %14 = arith.addf %11, %13 : vector<8x256xf32>
    %15 = vector.extract_strided_slice %14 {offsets = [0, 0], sizes = [8, 128], strides = [1, 1]} : vector<8x256xf32> to vector<8x128xf32>
    %16 = vector.extract_strided_slice %14 {offsets = [0, 128], sizes = [8, 128], strides = [1, 1]} : vector<8x256xf32> to vector<8x128xf32>
    %17 = tpu.iota {dimensions = array<i32: 1>} : vector<8x128xi32>
    %c32_i32 = arith.constant 32 : i32
    %18 = vector.broadcast %c32_i32 : i32 to vector<8x128xi32>
    %19 = arith.cmpi sge, %17, %18 : vector<8x128xi32>
    %c52_i32 = arith.constant 52 : i32
    %20 = vector.broadcast %c52_i32 : i32 to vector<8x128xi32>
    %21 = arith.cmpi slt, %17, %20 : vector<8x128xi32>
    %22 = arith.andi %19, %21 : vector<8x128xi1>
    %cst_11 = arith.constant 5.000000e-01 : f32
    %23 = vector.broadcast %cst_11 : f32 to vector<8x128xf32>
    %24 = arith.mulf %23, %16 : vector<8x128xf32>
    %25 = math.exp %24 : vector<8x128xf32>
    %c0_12 = arith.constant 0 : index
    %c0_13 = arith.constant 0 : index
    %26 = vector.load %arg6[%c0_12, %c0_13] : memref<8x128xbf16, #tpu.memory_space<vmem>>, vector<8x128xbf16>
    %27 = arith.extf %26 : vector<8x128xbf16> to vector<8x128xf32>
    %28 = arith.mulf %27, %25 : vector<8x128xf32>
    %29 = arith.addf %15, %28 : vector<8x128xf32>
    %30 = arith.select %22, %29, %15 : vector<8x128xi1>, vector<8x128xf32>
    %c0_14 = arith.constant 0 : index
    %c0_15 = arith.constant 0 : index
    %31 = vector.load %arg7[%c0_14, %c0_15] : memref<8x128xf32, #tpu.memory_space<vmem>>, vector<8x128xf32>
    tpu.vector_store %arg7[%c0_14, %c0_15], %30 {strides = array<i32>} : memref<8x128xf32, #tpu.memory_space<vmem>>, vector<8x128xf32>,
    return
  }
  func.func @transform_0(%arg0: i32) -> (i32, i32) {
    %c0_i32 = arith.constant 0 : i32
    %c0_i32_0 = arith.constant 0 : i32
    return %arg0, %c0_i32 : i32, i32
  }
  func.func @transform_1(%arg0: i32) -> (i32, i32) {
    %c0_i32 = arith.constant 0 : i32
    %c0_i32_0 = arith.constant 0 : i32
    %c0_i32_1 = arith.constant 0 : i32
    return %c0_i32, %c0_i32_0 : i32, i32
  }
  func.func @transform_2(%arg0: i32) -> (i32, i32) {
    %c0_i32 = arith.constant 0 : i32
    %c0_i32_0 = arith.constant 0 : i32
    %c0_i32_1 = arith.constant 0 : i32
    return %c0_i32, %c0_i32_0 : i32, i32
  }
  func.func @transform_3(%arg0: i32) -> (i32, i32) {
    %c0_i32 = arith.constant 0 : i32
    %c0_i32_0 = arith.constant 0 : i32
    %c0_i32_1 = arith.constant 0 : i32
    return %c0_i32, %c0_i32_0 : i32, i32
  }
  func.func @transform_4(%arg0: i32) -> (i32, i32) {
    %c0_i32 = arith.constant 0 : i32
    %c0_i32_0 = arith.constant 0 : i32
    %c0_i32_1 = arith.constant 0 : i32
    return %c0_i32, %c0_i32_0 : i32, i32
  }
  func.func @transform_5(%arg0: i32) -> (i32, i32) {
    %c0_i32 = arith.constant 0 : i32
    %c0_i32_0 = arith.constant 0 : i32
    return %arg0, %c0_i32 : i32, i32
  }
  func.func @transform_6(%arg0: i32) -> (i32, i32) {
    %c0_i32 = arith.constant 0 : i32
    %c0_i32_0 = arith.constant 0 : i32
    return %arg0, %c0_i32 : i32, i32
  }
}

</mosaic_0001>

<bundles_post_ra>
// kernel: encoder_apply.1
= control target key start
LH: loop header
LB: loop body
LE: loop exit
PB: predicated region body
PF: predicated region fallthrough
CT: control target
= control target key end

     0   :  { %11 = vsyncpa [#allocation3], 0  ;;  %s3315_s0 = inlined_call_operand.vmem [shape: f32[2,784], index: 0, kind: input, shape index: {}]   ;;  %s3316_s1 = inlined_call_operand.hbm [shape: bf16[784,512], index: 1, kind: input, shape index: {}]   ;;  %s3317_s2 = inlined_call_operand.hbm [shape: f32[1,512], index: 2, kind: input, shape index: {}]   ;;  %s3318_s3 = inlined_call_operand.hbm [shape: bf16[512,256], index: 3, kind: input, shape index: {}]   ;;  %s3319_s4 = inlined_call_operand.hbm [shape: f32[1,256], index: 4, kind: input, shape index: {}]   ;;  %s3320_s5 = inlined_call_operand.vmem [shape: bf16[2,128], index: 5, kind: input, shape index: {}]   ;;  %s3321_s6 = inlined_call_operand.vmem [shape: f32[2,128], index: 6, kind: output, shape index: {}]  }
   0x1   :  { %12 = vsyncpa [#allocation5], 0 }
   0x2   :  { %13 = vsyncpa [#allocation8], 0  ;;  %s3103_s21 = smov [#allocation4]   ;;  %s3104_s23 = smov [#allocation2]  }
   0x3   :  { %s34_s22 = sshll.u32 %s3103_s21, 4  ;;  %s21_s24 = sshll.u32 %s3104_s23, 4  ;;  %s35_s22 = int_to_ptr.vmem [resolvable:$true] %s34_s22  ;;  %s3148_s24 = int_to_ptr.vmem [resolvable:$true] %s21_s24 }
   0x4   :  { %s3009_s27 = scalar_lea.hbm %s3317_s2, 64 }
   0x5   :  { %p3010_p0 = scmp.ne.s32.totalorder %s3317_s2, %s3009_s27  ;;  %p3013_p1 = scmp.lt.u32.totalorder %s3009_s27, %s3317_s2 }
   0x7   :  { %p3015_p2 = pnand %p3013_p1, %p3010_p0 }
   0x9   :  { %3018 = shalt.err (!%p3015_p2)
}
   0xa   :  { %s3019_s8 = scalar_lea.vmem %s35_s22, 64  ;;  %p3024_p4 = scmp.lt.s32.totalorder %s35_s22, %s35_s22 }
   0xb   :  { %p3020_p3 = scmp.ne.s32.totalorder %s35_s22, %s3019_s8  ;;  %p3025_p5 = scmp.lt.s32.totalorder %s3019_s8, %s3019_s8 }
   0xd   :  { %p3026_p6 = por %p3025_p5, %p3024_p4 }
   0xf   :  { %p3027_p7 = pnand %p3026_p6, %p3020_p3 }
  0x11   :  { %3030 = shalt.err (!%p3027_p7)
}
  0x12   :  { %37 = dma.hbm_to_vmem [thread:$0]  %s3317_s2, 64, %s35_s22, [#allocation5]  }
  0x13   :  { %s3031_s13 = scalar_lea.hbm %s3316_s1, 25088 }
  0x14   :  { %p3032_p8 = scmp.ne.s32.totalorder %s3316_s1, %s3031_s13  ;;  %p3035_p9 = scmp.lt.u32.totalorder %s3031_s13, %s3316_s1 }
  0x16   :  { %p3037_p10 = pnand %p3035_p9, %p3032_p8 }
  0x18   :  { %3040 = shalt.err (!%p3037_p10)
}
  0x19   :  { %s3041_s18 = scalar_lea.vmem %s3148_s24, 25088  ;;  %p3046_p12 = scmp.lt.s32.totalorder %s3148_s24, %s3148_s24 }
  0x1a   :  { %p3042_p11 = scmp.ne.s32.totalorder %s3148_s24, %s3041_s18  ;;  %p3047_p13 = scmp.lt.s32.totalorder %s3041_s18, %s3041_s18 }
  0x1c   :  { %p3048_p0 = por %p3047_p13, %p3046_p12 }
  0x1e   :  { %p3049_p1 = pnand %p3048_p0, %p3042_p11 }
  0x20   :  { %3052 = shalt.err (!%p3049_p1)
}
  0x21   :  { %s3105_s2 = smov 256   ;;  %s3106_s19 = smov 16  }
  0x22   :  { %27 = dma.hbm_to_vmem [thread:$0]  %s3316_s1, 25088, %s3148_s24, [#allocation3], %s3105_s2, %s3105_s2, %s3106_s19  }
  0x23   :  { %s3107_s22 = smov [#allocation6]   ;;  %s3053_s27 = scalar_lea.hbm %s3318_s3, 8192 }
  0x24   :  { %s43_s23 = sshll.u32 %s3107_s22, 4  ;;  %p3054_p2 = scmp.ne.s32.totalorder %s3318_s3, %s3053_s27  ;;  %s44_s23 = int_to_ptr.vmem [resolvable:$true] %s43_s23 }
  0x25   :  { %p3057_p3 = scmp.lt.u32.totalorder %s3053_s27, %s3318_s3 }
  0x27   :  { %p3059_p4 = pnand %p3057_p3, %p3054_p2 }
  0x29   :  { %3062 = shalt.err (!%p3059_p4)
}
  0x2a   :  { %s3063_s8 = scalar_lea.vmem %s44_s23, 8192  ;;  %p3068_p6 = scmp.lt.s32.totalorder %s44_s23, %s44_s23 }
  0x2b   :  { %p3064_p5 = scmp.ne.s32.totalorder %s44_s23, %s3063_s8  ;;  %p3069_p7 = scmp.lt.s32.totalorder %s3063_s8, %s3063_s8 }
  0x2d   :  { %p3070_p8 = por %p3069_p7, %p3068_p6 }
  0x2f   :  { %p3071_p9 = pnand %p3070_p8, %p3064_p5 }
  0x31   :  { %3074 = shalt.err (!%p3071_p9)
}
  0x32   :  { %s3108_s1 = smov 128   ;;  %s3109_s24 = smov 8  }
  0x33   :  { %49 = dma.hbm_to_vmem [thread:$0]  %s3318_s3, 8192, %s44_s23, [#allocation5], %s3108_s1, %s3108_s1, %s3109_s24  }
  0x34   :  { %s3110_s11 = smov [#allocation7]   ;;  %s3075_s15 = scalar_lea.hbm %s3319_s4, 32 }
  0x35   :  { %s56_s12 = sshll.u32 %s3110_s11, 4  ;;  %p3076_p10 = scmp.ne.s32.totalorder %s3319_s4, %s3075_s15  ;;  %s57_s12 = int_to_ptr.vmem [resolvable:$true] %s56_s12 }
  0x36   :  { %p3079_p11 = scmp.lt.u32.totalorder %s3075_s15, %s3319_s4 }
  0x38   :  { %p3081_p12 = pnand %p3079_p11, %p3076_p10 }
  0x3a   :  { %3084 = shalt.err (!%p3081_p12)
}
  0x3b   :  { %s3085_s19 = scalar_lea.vmem %s57_s12, 32  ;;  %p3090_p0 = scmp.lt.s32.totalorder %s57_s12, %s57_s12 }
  0x3c   :  { %p3086_p13 = scmp.ne.s32.totalorder %s57_s12, %s3085_s19  ;;  %p3091_p1 = scmp.lt.s32.totalorder %s3085_s19, %s3085_s19 }
  0x3e   :  { %p3092_p2 = por %p3091_p1, %p3090_p0 }
  0x40   :  { %p3093_p3 = pnand %p3092_p2, %p3086_p13 }
  0x42   :  { %3096 = shalt.err (!%p3093_p3)
}
  0x43   :  { %59 = dma.hbm_to_vmem [thread:$0]  %s3319_s4, 32, %s57_s12, [#allocation8]  }
  0x44   :  { %3097 = dma.done.wait [#allocation3], 25088  }
  0x45   :  { %3098 = vsyncadd [#allocation3], 4294942208 }
  0x46   :  { %3099 = dma.done.wait [#allocation5], 8256  }
  0x47   :  { %3100 = vsyncadd [#allocation5], 4294959040 }
  0x48   :  { %3101 = dma.done.wait [#allocation8], 32  }
  0x49   :  { %3102 = vsyncadd [#allocation8], 4294967264  ;;  %v2605_v0 = vld [vmem:[#allocation2 + $0x4] ss:$16 sps:$4 sm:$0xff]   ;;  %v2609_v2 = vld [vmem:[#allocation2] ss:$16 sps:$4 sm:$0xff]   ;;  %v98_v40 = vlaneseq }
  0x4a   :  { %v2607_v1 = vld [vmem:[#allocation2 + $0x204] ss:$16 sps:$4 sm:$0xff]   ;;  %1378 = vmatprep.subr.bf16.mxu1 %v2605_v0  ;;  %v2610_v3 = vld [vmem:[#allocation2 + $0x200] ss:$16 sps:$4 sm:$0xff]   ;;  %v3111_v38 = vmov 1983009808  }
  0x4b   :  { %1419 = vmatprep.subr.bf16.mxu0 %v2607_v1  ;;  %v2611_v4 = vld [vmem:[#allocation2 + $0x24] ss:$16 sps:$4 sm:$0xff]   ;;  %1379 = vmatpush1.bf16.msra.mxu1 %v2609_v2  ;;  %v2615_v6 = vld [vmem:[#allocation2 + $0x20] ss:$16 sps:$4 sm:$0xff]   ;;  %v96_v39 = vunpack.c.l.s4 %v3111_v38  ;;  %v3204_v46 = vshrl.u32 %v98_v40, 7  ;;  %vm1374_vm0 = vcmask 130048  }
  0x4c   :  { %1420 = vmatpush1.bf16.msra.mxu0 %v2610_v3  ;;  %v2613_v5 = vld [vmem:[#allocation2 + $0x224] ss:$16 sps:$4 sm:$0xff]   ;;  %1380 = vmatprep.subr.bf16.mxu1 %v2611_v4  ;;  %v2616_v7 = vld [vmem:[#allocation2 + $0x220] ss:$16 sps:$4 sm:$0xff]   ;;  %v2703_v57 = vld [vmem:[%s3315_s0 + $0x1c] ss:$14 sps:$4 sm:$0xff]  }
  0x4d   :  { %1421 = vmatprep.subr.bf16.mxu0 %v2613_v5  ;;  %v2617_v8 = vld [vmem:[#allocation2 + $0x44] ss:$16 sps:$4 sm:$0xff]   ;;  %v2621_v10 = vld [vmem:[#allocation2 + $0x40] ss:$16 sps:$4 sm:$0xff]   ;;  %v97_v45 = vunpack.c.0.s8 %v96_v39  ;;  %v2736_v39 = vld [vmem:[#allocation2 + $0x8c] ss:$16 sps:$4 sm:$0xff]  }
  0x4e   :  { %v2619_v9 = vld [vmem:[#allocation2 + $0x244] ss:$16 sps:$4 sm:$0xff]   ;;  %v2622_v11 = vld [vmem:[#allocation2 + $0x240] ss:$16 sps:$4 sm:$0xff]  }
  0x4f   :  { %1381 = vmatpush1.bf16.msra.mxu1 %v2615_v6  ;;  %v2623_v12 = vld [vmem:[#allocation2 + $0x64] ss:$16 sps:$4 sm:$0xff]   ;;  %v2627_v14 = vld [vmem:[#allocation2 + $0x60] ss:$16 sps:$4 sm:$0xff]   ;;  %v3207_v53 = vsub.s32 %v97_v45, %v3204_v46 }
  0x50   :  { %1422 = vmatpush1.bf16.msra.mxu0 %v2616_v7  ;;  %1382 = vmatprep.subr.bf16.mxu1 %v2617_v8  ;;  %v2625_v13 = vld [vmem:[#allocation2 + $0x264] ss:$16 sps:$4 sm:$0xff]   ;;  %v2628_v15 = vld [vmem:[#allocation2 + $0x260] ss:$16 sps:$4 sm:$0xff]  }
  0x51   :  { %1423 = vmatprep.subr.bf16.mxu0 %v2619_v9  ;;  %v2629_v16 = vld [vmem:[#allocation2 + $0x84] ss:$16 sps:$4 sm:$0xff]   ;;  %v2633_v18 = vld [vmem:[#allocation2 + $0x80] ss:$16 sps:$4 sm:$0xff]   ;;  %v115_v61 = vrot.slane %v2703_v57, %v3207_v53 }
  0x52   :  { %v2631_v17 = vld [vmem:[#allocation2 + $0x284] ss:$16 sps:$4 sm:$0xff]   ;;  %v2634_v19 = vld [vmem:[#allocation2 + $0x280] ss:$16 sps:$4 sm:$0xff]  }
  0x53   :  { %1383 = vmatpush1.bf16.msra.mxu1 %v2621_v10  ;;  %v2635_v20 = vld [vmem:[#allocation2 + $0xa4] ss:$16 sps:$4 sm:$0xff]   ;;  %v2639_v22 = vld [vmem:[#allocation2 + $0xa0] ss:$16 sps:$4 sm:$0xff]  }
  0x54   :  { %1424 = vmatpush1.bf16.msra.mxu0 %v2622_v11  ;;  %1384 = vmatprep.subr.bf16.mxu1 %v2623_v12  ;;  %v2637_v21 = vld [vmem:[#allocation2 + $0x2a4] ss:$16 sps:$4 sm:$0xff]   ;;  %v2640_v23 = vld [vmem:[#allocation2 + $0x2a0] ss:$16 sps:$4 sm:$0xff]  }
  0x55   :  { %1425 = vmatprep.subr.bf16.mxu0 %v2625_v13  ;;  %v2641_v24 = vld [vmem:[#allocation2 + $0xc4] ss:$16 sps:$4 sm:$0xff]   ;;  %v2645_v26 = vld [vmem:[#allocation2 + $0xc0] ss:$16 sps:$4 sm:$0xff]  }
  0x56   :  { %v2643_v25 = vld [vmem:[#allocation2 + $0x2c4] ss:$16 sps:$4 sm:$0xff]   ;;  %v2646_v27 = vld [vmem:[#allocation2 + $0x2c0] ss:$16 sps:$4 sm:$0xff]  }
  0x57   :  { %1385 = vmatpush1.bf16.msra.mxu1 %v2627_v14  ;;  %v2647_v28 = vld [vmem:[#allocation2 + $0xe4] ss:$16 sps:$4 sm:$0xff]   ;;  %v2651_v30 = vld [vmem:[#allocation2 + $0xe0] ss:$16 sps:$4 sm:$0xff]  }
  0x58   :  { %1426 = vmatpush1.bf16.msra.mxu0 %v2628_v15  ;;  %1386 = vmatprep.subr.bf16.mxu1 %v2629_v16  ;;  %v2649_v29 = vld [vmem:[#allocation2 + $0x2e4] ss:$16 sps:$4 sm:$0xff]   ;;  %v2652_v31 = vld [vmem:[#allocation2 + $0x2e0] ss:$16 sps:$4 sm:$0xff]  }
  0x59   :  { %1427 = vmatprep.subr.bf16.mxu0 %v2631_v17  ;;  %v2653_v32 = vld [vmem:[#allocation2 + $0x104] ss:$16 sps:$4 sm:$0xff]   ;;  %v2657_v34 = vld [vmem:[#allocation2 + $0x100] ss:$16 sps:$4 sm:$0xff]  }
  0x5a   :  { %v2655_v33 = vld [vmem:[#allocation2 + $0x304] ss:$16 sps:$4 sm:$0xff]   ;;  %v2658_v35 = vld [vmem:[#allocation2 + $0x300] ss:$16 sps:$4 sm:$0xff]  }
  0x5b   :  { %1387 = vmatpush1.bf16.msra.mxu1 %v2633_v18  ;;  %v2659_v36 = vld [vmem:[#allocation2 + $0x124] ss:$16 sps:$4 sm:$0xff]   ;;  %v2663_v41 = vld [vmem:[#allocation2 + $0x120] ss:$16 sps:$4 sm:$0xff]  }
  0x5c   :  { %1428 = vmatpush1.bf16.msra.mxu0 %v2634_v19  ;;  %1388 = vmatprep.subr.bf16.mxu1 %v2635_v20  ;;  %v2661_v37 = vld [vmem:[#allocation2 + $0x324] ss:$16 sps:$4 sm:$0xff]   ;;  %v2664_v42 = vld [vmem:[#allocation2 + $0x320] ss:$16 sps:$4 sm:$0xff]  }
  0x5d   :  { %1429 = vmatprep.subr.bf16.mxu0 %v2637_v21  ;;  %v2665_v43 = vld [vmem:[#allocation2 + $0x144] ss:$16 sps:$4 sm:$0xff]   ;;  %v2669_v47 = vld [vmem:[#allocation2 + $0x140] ss:$16 sps:$4 sm:$0xff]   ;;  %v2712_v21 = vld [vmem:[#allocation2 + $0xc] ss:$16 sps:$4 sm:$0xff]  }
  0x5e   :  { %v2667_v44 = vld [vmem:[#allocation2 + $0x344] ss:$16 sps:$4 sm:$0xff]   ;;  %v2670_v48 = vld [vmem:[#allocation2 + $0x340] ss:$16 sps:$4 sm:$0xff]  }
  0x5f   :  { %1389 = vmatpush1.bf16.msra.mxu1 %v2639_v22  ;;  %v2671_v49 = vld [vmem:[#allocation2 + $0x164] ss:$16 sps:$4 sm:$0xff]   ;;  %v2675_v51 = vld [vmem:[#allocation2 + $0x160] ss:$16 sps:$4 sm:$0xff]  }
  0x60   :  { %1430 = vmatpush1.bf16.msra.mxu0 %v2640_v23  ;;  %1390 = vmatprep.subr.bf16.mxu1 %v2641_v24  ;;  %v2673_v50 = vld [vmem:[#allocation2 + $0x364] ss:$16 sps:$4 sm:$0xff]   ;;  %v2676_v52 = vld [vmem:[#allocation2 + $0x360] ss:$16 sps:$4 sm:$0xff]   ;;  %v2710_v24 = vld [vmem:[#allocation2 + $0x8] ss:$16 sps:$4 sm:$0xff]  }
  0x61   :  { %1431 = vmatprep.subr.bf16.mxu0 %v2643_v25  ;;  %v2677_v54 = vld [vmem:[#allocation2 + $0x184] ss:$16 sps:$4 sm:$0xff]   ;;  %v2701_v56 = vld [vmem:[%s3315_s0] ss:$14 sps:$4 sm:$0xff]  }
  0x62   :  { %v2679_v55 = vld [vmem:[#allocation2 + $0x384] ss:$16 sps:$4 sm:$0xff]   ;;  %v2706_v59 = vld [vmem:[%s3315_s0 + $0x20] ss:$14 sps:$4 sm:$0xff]   ;;  %v101_v60 = vrot.slane %v2701_v56, %v3207_v53 }
  0x63   :  { %1391 = vmatpush1.bf16.msra.mxu1 %v2645_v26  ;;  %v2705_v58 = vld [vmem:[%s3315_s0 + $0x4] ss:$14 sps:$4 sm:$0xff]   ;;  %v122_v1 = vrot.slane %v2706_v59, %v3207_v53 }
  0x64   :  { %1432 = vmatpush1.bf16.msra.mxu0 %v2646_v27  ;;  %1392 = vmatprep.subr.bf16.mxu1 %v2647_v28  ;;  %v108_v62 = vrot.slane %v2705_v58, %v3207_v53  ;;  %v2681_v63 = vld [vmem:[#allocation2 + $0x180] ss:$16 sps:$4 sm:$0xff]   ;;  %v2683_v2 = vld [vmem:[#allocation2 + $0x1a4] ss:$16 sps:$4 sm:$0xff]   ;;  %v124_v3 = vcombine.high %v101_v60, %v115_v61  ;;  %v123_v18 = vcombine.low %v101_v60, %v115_v61  ;;  %v2718_v27 = vld [vmem:[#allocation2 + $0x2c] ss:$16 sps:$4 sm:$0xff]  }
  0x65   :  { %1433 = vmatprep.subr.bf16.mxu0 %v2649_v29  ;;  %v2682_v0 = vld [vmem:[#allocation2 + $0x380] ss:$16 sps:$4 sm:$0xff]   ;;  %v2685_v4 = vld [vmem:[#allocation2 + $0x3a4] ss:$16 sps:$4 sm:$0xff]   ;;  %v2716_v29 = vld [vmem:[#allocation2 + $0x28] ss:$16 sps:$4 sm:$0xff]  }
  0x66   :  { %v126_v5 = vcombine.high %v108_v62, %v122_v1  ;;  %v170_v6 = vpack.c.bf16 %v124_v3, %v124_v3  ;;  %v2687_v7 = vld [vmem:[#allocation2 + $0x1a0] ss:$16 sps:$4 sm:$0xff]   ;;  %v2689_v10 = vld [vmem:[#allocation2 + $0x1c4] ss:$16 sps:$4 sm:$0xff]   ;;  %v125_v19 = vcombine.low %v108_v62, %v122_v1  ;;  %v3228_v22 = vpack.c.bf16 %v123_v18, %v123_v18  ;;  %v2752_v60 = vld [vmem:[#allocation2 + $0xe8] ss:$16 sps:$4 sm:$0xff]  }
  0x67   :  { %1393 = vmatpush1.bf16.msra.mxu1 %v2651_v30  ;;  %v2688_v8 = vld [vmem:[#allocation2 + $0x3a0] ss:$16 sps:$4 sm:$0xff]   ;;  %v2691_v11 = vld [vmem:[#allocation2 + $0x3c4] ss:$16 sps:$4 sm:$0xff]   ;;  %v2760_v62 = vld [vmem:[#allocation2 + $0x10c] ss:$16 sps:$4 sm:$0xff]  }
  0x68   :  { %1434 = vmatpush1.bf16.msra.mxu0 %v2652_v31  ;;  %1394 = vmatprep.subr.bf16.mxu1 %v2653_v32  ;;  %v3225_v9 = vpack.c.bf16 %v126_v5, %v126_v5  ;;  %v2693_v12 = vld [vmem:[#allocation2 + $0x1c0] ss:$16 sps:$4 sm:$0xff]   ;;  %v2695_v14 = vld [vmem:[#allocation2 + $0x1e4] ss:$16 sps:$4 sm:$0xff]   ;;  %v3230_v25 = vpack.c.bf16 %v125_v19, %v125_v19  ;;  %v2724_v31 = vld [vmem:[#allocation2 + $0x4c] ss:$16 sps:$4 sm:$0xff]  }
  0x69   :  { %1435 = vmatprep.subr.bf16.mxu0 %v2655_v33  ;;  %1410 = vmatprep.mubr.bf16.mxu1 %v170_v6  ;;  %v2694_v13 = vld [vmem:[#allocation2 + $0x3c0] ss:$16 sps:$4 sm:$0xff]   ;;  %v2697_v15 = vld [vmem:[#allocation2 + $0x3e4] ss:$16 sps:$4 sm:$0xff]   ;;  %v2722_v33 = vld [vmem:[#allocation2 + $0x48] ss:$16 sps:$4 sm:$0xff]  }
  0x6a   :  { %1451 = vmatprep.mubr.bf16.mxu0 %v3225_v9  ;;  %v2699_v16 = vld [vmem:[#allocation2 + $0x1e0] ss:$16 sps:$4 sm:$0xff]   ;;  %v2709_v20 = vld [vmem:[#allocation2 + $0x404] ss:$16 sps:$4 sm:$0xff]   ;;  %v2782_v19 = vld [vmem:[#allocation2 + $0x188] ss:$16 sps:$4 sm:$0xff]  }
  0x6b   :  { %1395 = vmatpush1.bf16.msra.mxu1 %v2657_v34  ;;  %v2700_v17 = vld [vmem:[#allocation2 + $0x3e0] ss:$16 sps:$4 sm:$0xff]   ;;  %v2715_v26 = vld [vmem:[#allocation2 + $0x424] ss:$16 sps:$4 sm:$0xff]  }
  0x6c   :  { %1436 = vmatpush1.bf16.msra.mxu0 %v2658_v35  ;;  %1396 = vmatprep.subr.bf16.mxu1 %v2659_v36  ;;  %v2707_v23 = vld [vmem:[#allocation2 + $0x400] ss:$16 sps:$4 sm:$0xff]   ;;  %v2721_v30 = vld [vmem:[#allocation2 + $0x444] ss:$16 sps:$4 sm:$0xff]   ;;  %v2730_v35 = vld [vmem:[#allocation2 + $0x6c] ss:$16 sps:$4 sm:$0xff]  }
  0x6d   :  { %1437 = vmatprep.subr.bf16.mxu0 %v2661_v37  ;;  %v2713_v28 = vld [vmem:[#allocation2 + $0x420] ss:$16 sps:$4 sm:$0xff]   ;;  %v2727_v34 = vld [vmem:[#allocation2 + $0x464] ss:$16 sps:$4 sm:$0xff]   ;;  %v2728_v37 = vld [vmem:[#allocation2 + $0x68] ss:$16 sps:$4 sm:$0xff]  }
  0x6e   :  { %v2719_v32 = vld [vmem:[#allocation2 + $0x440] ss:$16 sps:$4 sm:$0xff]   ;;  %v2733_v38 = vld [vmem:[#allocation2 + $0x484] ss:$16 sps:$4 sm:$0xff]  }
  0x6f   :  { %1397 = vmatpush1.bf16.msra.mxu1 %v2663_v41  ;;  %v2725_v36 = vld [vmem:[#allocation2 + $0x460] ss:$16 sps:$4 sm:$0xff]   ;;  %v2757_v61 = vld [vmem:[#allocation2 + $0x504] ss:$16 sps:$4 sm:$0xff]  }
  0x70   :  { %1438 = vmatpush1.bf16.msra.mxu0 %v2664_v42  ;;  %1398 = vmatprep.subr.bf16.mxu1 %v2665_v43  ;;  %v2731_v41 = vld [vmem:[#allocation2 + $0x480] ss:$16 sps:$4 sm:$0xff]   ;;  %v2734_v42 = vld [vmem:[#allocation2 + $0x88] ss:$16 sps:$4 sm:$0xff]   ;;  %v2739_v43 = vld [vmem:[#allocation2 + $0x4a4] ss:$16 sps:$4 sm:$0xff]  }
  0x71   :  { %1439 = vmatprep.subr.bf16.mxu0 %v2667_v44  ;;  %v2742_v44 = vld [vmem:[#allocation2 + $0xac] ss:$16 sps:$4 sm:$0xff]   ;;  %v2737_v45 = vld [vmem:[#allocation2 + $0x4a0] ss:$16 sps:$4 sm:$0xff]   ;;  %v2763_v3 = vld [vmem:[#allocation2 + $0x524] ss:$16 sps:$4 sm:$0xff]  }
  0x72   :  { %v2806_v56 = vld [vmem:[%s3315_s0 + $0x24] ss:$14 sps:$4 sm:$0xff]  }
  0x73   :  { %1399 = vmatpush1.bf16.msra.mxu1 %v2669_v47  ;;  %v2740_v47 = vld [vmem:[#allocation2 + $0xa8] ss:$16 sps:$4 sm:$0xff]   ;;  %v2749_v57 = vld [vmem:[#allocation2 + $0x4e0] ss:$16 sps:$4 sm:$0xff]   ;;  %v3244_v59 = vrot.slane %v2806_v56, %v3207_v53  ;;  %v2826_v56 = vld [vmem:[#allocation2 + $0x28c] ss:$16 sps:$4 sm:$0xff]  }
  0x74   :  { %1440 = vmatpush1.bf16.msra.mxu0 %v2670_v48  ;;  %1400 = vmatprep.subr.bf16.mxu1 %v2671_v49  ;;  %v2745_v48 = vld [vmem:[#allocation2 + $0x4c4] ss:$16 sps:$4 sm:$0xff]   ;;  %v2748_v49 = vld [vmem:[#allocation2 + $0xcc] ss:$16 sps:$4 sm:$0xff]   ;;  %v2761_v5 = vld [vmem:[#allocation2 + $0x520] ss:$16 sps:$4 sm:$0xff]  }
  0x75   :  { %1441 = vmatprep.subr.bf16.mxu0 %v2673_v50  ;;  %v2743_v50 = vld [vmem:[#allocation2 + $0x4c0] ss:$16 sps:$4 sm:$0xff]  }
  0x76   :  { %v2779_v18 = vld [vmem:[#allocation2 + $0x580] ss:$16 sps:$4 sm:$0xff]  }
  0x77   :  { %1401 = vmatpush1.bf16.msra.mxu1 %v2675_v51  ;;  %v2746_v51 = vld [vmem:[#allocation2 + $0xc8] ss:$16 sps:$4 sm:$0xff]  }
  0x78   :  { %1442 = vmatpush1.bf16.msra.mxu0 %v2676_v52  ;;  %1402 = vmatprep.subr.bf16.mxu1 %v2677_v54  ;;  %v2751_v52 = vld [vmem:[#allocation2 + $0x4e4] ss:$16 sps:$4 sm:$0xff]   ;;  %v2754_v54 = vld [vmem:[#allocation2 + $0xec] ss:$16 sps:$4 sm:$0xff]  }
  0x79   :  { %1443 = vmatprep.subr.bf16.mxu0 %v2679_v55  ;;  %v2803_v55 = vld [vmem:[%s3315_s0 + $0x8] ss:$14 sps:$4 sm:$0xff]  }
  0x7a   :  { %v3241_v58 = vrot.slane %v2803_v55, %v3207_v53 }
  0x7b   :  { %1403 = vmatpush1.bf16.msra.mxu1 %v2681_v63 }
  0x7c   :  { %1444 = vmatpush1.bf16.msra.mxu0 %v2682_v0  ;;  %1404 = vmatprep.subr.bf16.mxu1 %v2683_v2  ;;  %v160_v63 = vcombine.high %v3241_v58, %v3244_v59  ;;  %v2755_v0 = vld [vmem:[#allocation2 + $0x500] ss:$16 sps:$4 sm:$0xff]   ;;  %v2758_v2 = vld [vmem:[#allocation2 + $0x108] ss:$16 sps:$4 sm:$0xff]  }
  0x7d   :  { %1445 = vmatprep.subr.bf16.mxu0 %v2685_v4  ;;  %v2766_v4 = vld [vmem:[#allocation2 + $0x12c] ss:$16 sps:$4 sm:$0xff]  }
  0x7e   :  { %v3248_v1 = vpack.c.bf16 %v160_v63, %v160_v63  ;;  %v2916_v63 = vld [vmem:[#allocation6 + $0x14] ss:$8 sps:$4 sm:$0xff]  }
  0x7f   :  { %1405 = vmatpush1.bf16.msra.mxu1 %v2687_v7  ;;  %v2769_v7 = vld [vmem:[#allocation2 + $0x544] ss:$16 sps:$4 sm:$0xff]  }
  0x80   :  { %1446 = vmatpush1.bf16.msra.mxu0 %v2688_v8  ;;  %1406 = vmatprep.subr.bf16.mxu1 %v2689_v10  ;;  %v2772_v8 = vld [vmem:[#allocation2 + $0x14c] ss:$16 sps:$4 sm:$0xff]   ;;  %v2767_v10 = vld [vmem:[#allocation2 + $0x540] ss:$16 sps:$4 sm:$0xff]  }
  0x81   :  { %1447 = vmatprep.subr.bf16.mxu0 %v2691_v11  ;;  %v2770_v11 = vld [vmem:[#allocation2 + $0x148] ss:$16 sps:$4 sm:$0xff]  }
  0x83   :  { %1407 = vmatpush1.bf16.msra.mxu1 %v2693_v12  ;;  %v2775_v12 = vld [vmem:[#allocation2 + $0x564] ss:$16 sps:$4 sm:$0xff]  }
  0x84   :  { %1448 = vmatpush1.bf16.msra.mxu0 %v2694_v13  ;;  %1408 = vmatprep.subr.bf16.mxu1 %v2695_v14  ;;  %v2778_v13 = vld [vmem:[#allocation2 + $0x16c] ss:$16 sps:$4 sm:$0xff]   ;;  %v2773_v14 = vld [vmem:[#allocation2 + $0x560] ss:$16 sps:$4 sm:$0xff]  }
  0x85   :  { %1449 = vmatprep.subr.bf16.mxu0 %v2697_v15  ;;  %v2776_v15 = vld [vmem:[#allocation2 + $0x168] ss:$16 sps:$4 sm:$0xff]  }
  0x87   :  { %1409 = vmatpush1.bf16.msra.mxu1 %v2699_v16  ;;  %v2781_v16 = vld [vmem:[#allocation2 + $0x584] ss:$16 sps:$4 sm:$0xff]  }
  0x88   :  { %1450 = vmatpush1.bf16.msra.mxu0 %v2700_v17  ;;  %1542 = vmatprep.subr.bf16.mxu1 %v2712_v21  ;;  %v2784_v17 = vld [vmem:[#allocation2 + $0x18c] ss:$16 sps:$4 sm:$0xff]  }
  0x89   :  { %1460 = vmatprep.subr.bf16.mxu0 %v2709_v20  ;;  %v2787_v20 = vld [vmem:[#allocation2 + $0x5a4] ss:$16 sps:$4 sm:$0xff]   ;;  %v2790_v21 = vld [vmem:[#allocation2 + $0x1ac] ss:$16 sps:$4 sm:$0xff]  }
  0x8a   :  { %1411 = vmatmul.mubr.bf16.vlgmr.msra.gmra.mrb[0].mxu1 %v3228_v22 }
  0x8b   :  { %1452 = vmatmul.mubr.bf16.vlgmr.msra.gmra.mrb[0].mxu0 %v3230_v25  ;;  %1543 = vmatpush1.bf16.msra.mxu1 %v2710_v24  ;;  %v2788_v24 = vld [vmem:[#allocation2 + $0x1a8] ss:$16 sps:$4 sm:$0xff]  }
  0x8c   :  { %1461 = vmatpush1.bf16.msra.mxu0 %v2707_v23  ;;  %1544 = vmatprep.subr.bf16.mxu1 %v2718_v27  ;;  %v2785_v23 = vld [vmem:[#allocation2 + $0x5a0] ss:$16 sps:$4 sm:$0xff]   ;;  %v2796_v27 = vld [vmem:[#allocation2 + $0x1cc] ss:$16 sps:$4 sm:$0xff]  }
  0x8d   :  { %1462 = vmatprep.subr.bf16.mxu0 %v2715_v26  ;;  %1574 = vmatprep.mubr.bf16.mxu1 %v170_v6  ;;  %v2764_v6 = vld [vmem:[#allocation2 + $0x128] ss:$16 sps:$4 sm:$0xff]   ;;  %v2793_v26 = vld [vmem:[#allocation2 + $0x5c4] ss:$16 sps:$4 sm:$0xff]  }
  0x8e   :  { %1492 = vmatprep.mubr.bf16.mxu0 %v3248_v1 }
  0x8f   :  { %1545 = vmatpush1.bf16.msra.mxu1 %v2716_v29  ;;  %v2794_v29 = vld [vmem:[#allocation2 + $0x1c8] ss:$16 sps:$4 sm:$0xff]  }
  0x90   :  { %1463 = vmatpush1.bf16.msra.mxu0 %v2713_v28  ;;  %1546 = vmatprep.subr.bf16.mxu1 %v2724_v31  ;;  %v2791_v28 = vld [vmem:[#allocation2 + $0x5c0] ss:$16 sps:$4 sm:$0xff]   ;;  %v2802_v31 = vld [vmem:[#allocation2 + $0x1ec] ss:$16 sps:$4 sm:$0xff]  }
  0x91   :  { %1464 = vmatprep.subr.bf16.mxu0 %v2721_v30  ;;  %v2799_v30 = vld [vmem:[#allocation2 + $0x5e4] ss:$16 sps:$4 sm:$0xff]  }
  0x93   :  { %1547 = vmatpush1.bf16.msra.mxu1 %v2722_v33  ;;  %v159_v33 = vcombine.low %v3241_v58, %v3244_v59  ;;  %v2832_v58 = vld [vmem:[#allocation2 + $0x2cc] ss:$16 sps:$4 sm:$0xff]   ;;  %v2830_v59 = vld [vmem:[#allocation2 + $0x2c8] ss:$16 sps:$4 sm:$0xff]  }
  0x94   :  { %1465 = vmatpush1.bf16.msra.mxu0 %v2719_v32  ;;  %1548 = vmatprep.subr.bf16.mxu1 %v2730_v35  ;;  %v2797_v32 = vld [vmem:[#allocation2 + $0x5e0] ss:$16 sps:$4 sm:$0xff]   ;;  %v2805_v35 = vld [vmem:[%s3315_s0 + $0xc] ss:$14 sps:$4 sm:$0x33]  }
  0x95   :  { %1466 = vmatprep.subr.bf16.mxu0 %v2727_v34  ;;  %v2800_v34 = vld [vmem:[#allocation2 + $0x1e8] ss:$16 sps:$4 sm:$0xff]  }
  0x97   :  { %1549 = vmatpush1.bf16.msra.mxu1 %v2728_v37  ;;  %v2817_v37 = vld [vmem:[#allocation2 + $0x604] ss:$16 sps:$4 sm:$0xff]  }
  0x98   :  { %1467 = vmatpush1.bf16.msra.mxu0 %v2725_v36  ;;  %1550 = vmatprep.subr.bf16.mxu1 %v2736_v39  ;;  %v2811_v36 = vld [vmem:[#allocation2 + $0x20c] ss:$16 sps:$4 sm:$0xff]   ;;  %v3259_v39 = vpack.c.bf16 %v159_v33, %v159_v33 }
  0x99   :  { %1468 = vmatprep.subr.bf16.mxu0 %v2733_v38  ;;  %v2808_v38 = vld [vmem:[%s3315_s0 + $0x28] ss:$14 sps:$4 sm:$0x33]  }
  0x9a   :  { %v2935_v33 = vld [vmem:[#allocation6 + $0x80] ss:$8 sps:$4 sm:$0xff]  }
  0x9b   :  { %1551 = vmatpush1.bf16.msra.mxu1 %v2734_v42  ;;  %v2815_v42 = vld [vmem:[#allocation2 + $0x600] ss:$16 sps:$4 sm:$0xff]  }
  0x9c   :  { %1469 = vmatpush1.bf16.msra.mxu0 %v2731_v41  ;;  %1552 = vmatprep.subr.bf16.mxu1 %v2742_v44  ;;  %v2809_v41 = vld [vmem:[#allocation2 + $0x208] ss:$16 sps:$4 sm:$0xff]   ;;  %v144_v44 = vrot.slane %v2805_v35, %v3207_v53 }
  0x9d   :  { %1470 = vmatprep.subr.bf16.mxu0 %v2739_v43  ;;  %v2814_v43 = vld [vmem:[#allocation2 + $0x22c] ss:$16 sps:$4 sm:$0xff]   ;;  %v2940_v35 = vld [vmem:[#allocation6 + $0x94] ss:$8 sps:$4 sm:$0xff]  }
  0x9f   :  { %1553 = vmatpush1.bf16.msra.mxu1 %v2740_v47  ;;  %v2812_v47 = vld [vmem:[#allocation2 + $0x228] ss:$16 sps:$4 sm:$0xff]  }
  0xa0   :  { %1471 = vmatpush1.bf16.msra.mxu0 %v2737_v45  ;;  %1554 = vmatprep.subr.bf16.mxu1 %v2748_v49  ;;  %v158_v45 = vrot.slane %v2808_v38, %v3207_v53  ;;  %v3112_v49 = vmov 0   ;;  %v2862_v38 = vld [vmem:[#allocation2 + $0x40c] ss:$16 sps:$4 sm:$0xff]  }
  0xa1   :  { %1472 = vmatprep.subr.bf16.mxu0 %v2745_v48  ;;  %v2820_v48 = vld [vmem:[#allocation2 + $0x24c] ss:$16 sps:$4 sm:$0xff]  }
  0xa3   :  { %1555 = vmatpush1.bf16.msra.mxu1 %v2746_v51  ;;  %v161_v51 = vcombine.low %v144_v44, %v158_v45  ;;  %v2941_v44 = vld [vmem:[#allocation6 + $0xa0] ss:$8 sps:$4 sm:$0xff]   ;;  %v2946_v45 = vld [vmem:[#allocation6 + $0xb4] ss:$8 sps:$4 sm:$0xff]  }
  0xa4   :  { %1473 = vmatpush1.bf16.msra.mxu0 %v2743_v50  ;;  %1556 = vmatprep.subr.bf16.mxu1 %v2754_v54  ;;  %v2818_v50 = vld [vmem:[#allocation2 + $0x248] ss:$16 sps:$4 sm:$0xff]  }
  0xa5   :  { %1474 = vmatprep.subr.bf16.mxu0 %v2751_v52  ;;  %v2823_v52 = vld [vmem:[#allocation2 + $0x26c] ss:$16 sps:$4 sm:$0xff]   ;;  %v2821_v54 = vld [vmem:[#allocation2 + $0x268] ss:$16 sps:$4 sm:$0xff]   ;;  %v3267_v55 = vpack.c.bf16 %v161_v51, %v161_v51 }
  0xa6   :  { %v2949_v51 = vld [vmem:[#allocation6 + $0xc4] ss:$8 sps:$4 sm:$0xff]  }
  0xa7   :  { %1557 = vmatpush1.bf16.msra.mxu1 %v2752_v60  ;;  %v2835_v60 = vld [vmem:[#allocation2 + $0x2ec] ss:$16 sps:$4 sm:$0xff]  }
  0xa8   :  { %1475 = vmatpush1.bf16.msra.mxu0 %v2749_v57  ;;  %1558 = vmatprep.subr.bf16.mxu1 %v2760_v62  ;;  %v2829_v57 = vld [vmem:[#allocation2 + $0x2ac] ss:$16 sps:$4 sm:$0xff]   ;;  %v2913_v62 = vld [vmem:[#allocation6 + $0x4] ss:$8 sps:$4 sm:$0xff]  }
  0xa9   :  { %1476 = vmatprep.subr.bf16.mxu0 %v2757_v61  ;;  %v2911_v61 = vld [vmem:[#allocation6] ss:$8 sps:$4 sm:$0xff]  }
  0xab   :  { %1559 = vmatpush1.bf16.msra.mxu1 %v2758_v2  ;;  %v2914_v2 = vld [vmem:[#allocation6 + $0x10] ss:$8 sps:$4 sm:$0xff]  }
  0xac   :  { %1477 = vmatpush1.bf16.msra.mxu0 %v2755_v0  ;;  %1560 = vmatprep.subr.bf16.mxu1 %v2766_v4  ;;  %v2833_v0 = vld [vmem:[#allocation2 + $0x2e8] ss:$16 sps:$4 sm:$0xff]  }
  0xad   :  { %1478 = vmatprep.subr.bf16.mxu0 %v2763_v3  ;;  %v2838_v3 = vld [vmem:[#allocation2 + $0x30c] ss:$16 sps:$4 sm:$0xff]   ;;  %v2919_v4 = vld [vmem:[#allocation6 + $0x24] ss:$8 sps:$4 sm:$0xff]  }
  0xaf   :  { %1561 = vmatpush1.bf16.msra.mxu1 %v2764_v6  ;;  %v2917_v6 = vld [vmem:[#allocation6 + $0x20] ss:$8 sps:$4 sm:$0xff]  }
  0xb0   :  { %1479 = vmatpush1.bf16.msra.mxu0 %v2761_v5  ;;  %1562 = vmatprep.subr.bf16.mxu1 %v2772_v8  ;;  %v2836_v5 = vld [vmem:[#allocation2 + $0x308] ss:$16 sps:$4 sm:$0xff]  }
  0xb1   :  { %1480 = vmatprep.subr.bf16.mxu0 %v2769_v7  ;;  %v2841_v7 = vld [vmem:[#allocation2 + $0x32c] ss:$16 sps:$4 sm:$0xff]   ;;  %v2922_v8 = vld [vmem:[#allocation6 + $0x34] ss:$8 sps:$4 sm:$0xff]  }
  0xb3   :  { %1563 = vmatpush1.bf16.msra.mxu1 %v2770_v11  ;;  %v2920_v11 = vld [vmem:[#allocation6 + $0x30] ss:$8 sps:$4 sm:$0xff]  }
  0xb4   :  { %1481 = vmatpush1.bf16.msra.mxu0 %v2767_v10  ;;  %1564 = vmatprep.subr.bf16.mxu1 %v2778_v13  ;;  %v2839_v10 = vld [vmem:[#allocation2 + $0x328] ss:$16 sps:$4 sm:$0xff]  }
  0xb5   :  { %1482 = vmatprep.subr.bf16.mxu0 %v2775_v12  ;;  %v2844_v12 = vld [vmem:[#allocation2 + $0x34c] ss:$16 sps:$4 sm:$0xff]   ;;  %v2925_v13 = vld [vmem:[#allocation6 + $0x44] ss:$8 sps:$4 sm:$0xff]  }
  0xb7   :  { %1565 = vmatpush1.bf16.msra.mxu1 %v2776_v15  ;;  %v2923_v15 = vld [vmem:[#allocation6 + $0x40] ss:$8 sps:$4 sm:$0xff]  }
  0xb8   :  { %1483 = vmatpush1.bf16.msra.mxu0 %v2773_v14  ;;  %1566 = vmatprep.subr.bf16.mxu1 %v2784_v17  ;;  %v2842_v14 = vld [vmem:[#allocation2 + $0x348] ss:$16 sps:$4 sm:$0xff]  }
  0xb9   :  { %1484 = vmatprep.subr.bf16.mxu0 %v2781_v16  ;;  %v2847_v16 = vld [vmem:[#allocation2 + $0x36c] ss:$16 sps:$4 sm:$0xff]   ;;  %v2928_v17 = vld [vmem:[#allocation6 + $0x54] ss:$8 sps:$4 sm:$0xff]  }
  0xbb   :  { %1567 = vmatpush1.bf16.msra.mxu1 %v2782_v19  ;;  %v2926_v19 = vld [vmem:[#allocation6 + $0x50] ss:$8 sps:$4 sm:$0xff]  }
  0xbc   :  { %1485 = vmatpush1.bf16.msra.mxu0 %v2779_v18  ;;  %1568 = vmatprep.subr.bf16.mxu1 %v2790_v21  ;;  %v2845_v18 = vld [vmem:[#allocation2 + $0x368] ss:$16 sps:$4 sm:$0xff]  }
  0xbd   :  { %1486 = vmatprep.subr.bf16.mxu0 %v2787_v20  ;;  %v2850_v20 = vld [vmem:[#allocation2 + $0x38c] ss:$16 sps:$4 sm:$0xff]   ;;  %v2931_v21 = vld [vmem:[#allocation6 + $0x64] ss:$8 sps:$4 sm:$0xff]  }
  0xbf   :  { %1569 = vmatpush1.bf16.msra.mxu1 %v2788_v24  ;;  %v2929_v24 = vld [vmem:[#allocation6 + $0x60] ss:$8 sps:$4 sm:$0xff]  }
  0xc0   :  { %1487 = vmatpush1.bf16.msra.mxu0 %v2785_v23  ;;  %1570 = vmatprep.subr.bf16.mxu1 %v2796_v27  ;;  %v2848_v23 = vld [vmem:[#allocation2 + $0x388] ss:$16 sps:$4 sm:$0xff]  }
  0xc1   :  { %1488 = vmatprep.subr.bf16.mxu0 %v2793_v26  ;;  %v2853_v26 = vld [vmem:[#allocation2 + $0x3ac] ss:$16 sps:$4 sm:$0xff]   ;;  %v2934_v27 = vld [vmem:[#allocation6 + $0x74] ss:$8 sps:$4 sm:$0xff]  }
  0xc3   :  { %1571 = vmatpush1.bf16.msra.mxu1 %v2794_v29  ;;  %v2932_v29 = vld [vmem:[#allocation6 + $0x70] ss:$8 sps:$4 sm:$0xff]  }
  0xc4   :  { %1489 = vmatpush1.bf16.msra.mxu0 %v2791_v28  ;;  %1572 = vmatprep.subr.bf16.mxu1 %v2802_v31  ;;  %v2851_v28 = vld [vmem:[#allocation2 + $0x3a8] ss:$16 sps:$4 sm:$0xff]  }
  0xc5   :  { %1490 = vmatprep.subr.bf16.mxu0 %v2799_v30  ;;  %v2856_v30 = vld [vmem:[#allocation2 + $0x3cc] ss:$16 sps:$4 sm:$0xff]   ;;  %v2937_v31 = vld [vmem:[#allocation6 + $0x84] ss:$8 sps:$4 sm:$0xff]  }
  0xc7   :  { %1573 = vmatpush1.bf16.msra.mxu1 %v2800_v34  ;;  %v2859_v34 = vld [vmem:[#allocation2 + $0x3ec] ss:$16 sps:$4 sm:$0xff]  }
  0xc8   :  { %1491 = vmatpush1.bf16.msra.mxu0 %v2797_v32  ;;  %1583 = vmatprep.subr.bf16.mxu1 %v2811_v36  ;;  %v2854_v32 = vld [vmem:[#allocation2 + $0x3c8] ss:$16 sps:$4 sm:$0xff]  }
  0xc9   :  { %1501 = vmatprep.subr.bf16.mxu0 %v2817_v37  ;;  %v2857_v36 = vld [vmem:[#allocation2 + $0x3e8] ss:$16 sps:$4 sm:$0xff]   ;;  %v2938_v37 = vld [vmem:[#allocation6 + $0x90] ss:$8 sps:$4 sm:$0xff]  }
  0xca   :  { %1575 = vmatmul.mubr.bf16.vlgmr.msra.gmra.mrb[4].mxu1 %v3228_v22  ;;  %v2824_v22 = vld [vmem:[#allocation2 + $0x288] ss:$16 sps:$4 sm:$0xff]  }
  0xcb   :  { %1493 = vmatmul.mubr.bf16.vlgmr.msra.gmra.mrb[0].mxu0 %v3259_v39  ;;  %1584 = vmatpush1.bf16.msra.mxu1 %v2809_v41  ;;  %v2943_v41 = vld [vmem:[#allocation6 + $0xa4] ss:$8 sps:$4 sm:$0xff]  }
  0xcc   :  { %1502 = vmatpush1.bf16.msra.mxu0 %v2815_v42  ;;  %1585 = vmatprep.subr.bf16.mxu1 %v2814_v43  ;;  %v2860_v42 = vld [vmem:[#allocation2 + $0x408] ss:$16 sps:$4 sm:$0xff]   ;;  %v2865_v43 = vld [vmem:[#allocation2 + $0x42c] ss:$16 sps:$4 sm:$0xff]  }
  0xcd   :  { %1533 = vmatprep.mubr.bf16.mxu0 %v3112_v49  ;;  %1615 = vmatprep.mubr.bf16.mxu1 %v3225_v9  ;;  %v2827_v9 = vld [vmem:[#allocation2 + $0x2a8] ss:$16 sps:$4 sm:$0xff]  }
  0xce   :  { %2110 = vmatprep.subr.bf16.mxu0 %v2913_v62  ;;  %v2883_v62 = vld [vmem:[#allocation2 + $0x4ec] ss:$16 sps:$4 sm:$0xff]  }
  0xcf   :  { %1586 = vmatpush1.bf16.msra.mxu1 %v2812_v47  ;;  %v2863_v47 = vld [vmem:[#allocation2 + $0x428] ss:$16 sps:$4 sm:$0xff]  }
  0xd0   :  { %1587 = vmatprep.subr.bf16.mxu1 %v2820_v48  ;;  %v2868_v48 = vld [vmem:[#allocation2 + $0x44c] ss:$16 sps:$4 sm:$0xff]  }
  0xd3   :  { %1588 = vmatpush1.bf16.msra.mxu1 %v2818_v50  ;;  %v2944_v50 = vld [vmem:[#allocation6 + $0xb0] ss:$8 sps:$4 sm:$0xff]  }
  0xd4   :  { %1589 = vmatprep.subr.bf16.mxu1 %v2823_v52  ;;  %v2866_v52 = vld [vmem:[#allocation2 + $0x448] ss:$16 sps:$4 sm:$0xff]  }
  0xd7   :  { %2497 = vmatmul.mubr.msk.bf16.vlgmr.msra.gmra.mrb[0].mxu0 %vm1374_vm0, %v3267_v55  ;;  %1590 = vmatpush1.bf16.msra.mxu1 %v2821_v54  ;;  %v2871_v54 = vld [vmem:[#allocation2 + $0x46c] ss:$16 sps:$4 sm:$0xff]  }
  0xd8   :  { %1591 = vmatprep.subr.bf16.mxu1 %v2826_v56  ;;  %2111 = vmatpush1.bf16.msra.mxu0 %v2911_v61  ;;  %v2947_v56 = vld [vmem:[#allocation6 + $0xc0] ss:$8 sps:$4 sm:$0xff]   ;;  %v2878_v61 = vld [vmem:[#allocation2 + $0x4c8] ss:$16 sps:$4 sm:$0xff]  }
  0xd9   :  { %2112 = vmatprep.subr.bf16.mxu0 %v2916_v63  ;;  %v2881_v63 = vld [vmem:[#allocation2 + $0x4e8] ss:$16 sps:$4 sm:$0xff]  }
  0xdb   :  { %1592 = vmatpush1.bf16.msra.mxu1 %v2824_v22  ;;  %v2952_v22 = vld [vmem:[#allocation6 + $0xd4] ss:$8 sps:$4 sm:$0xff]  }
  0xdc   :  { %1593 = vmatprep.subr.bf16.mxu1 %v2829_v57  ;;  %2113 = vmatpush1.bf16.msra.mxu0 %v2914_v2  ;;  %v2874_v57 = vld [vmem:[#allocation2 + $0x48c] ss:$16 sps:$4 sm:$0xff]   ;;  %v2884_v2 = vld [vmem:[#allocation2 + $0x508] ss:$16 sps:$4 sm:$0xff]  }
  0xdd   :  { %2114 = vmatprep.subr.bf16.mxu0 %v2919_v4  ;;  %v2955_v4 = vld [vmem:[#allocation6 + $0xe4] ss:$8 sps:$4 sm:$0xff]  }
  0xdf   :  { %1594 = vmatpush1.bf16.msra.mxu1 %v2827_v9  ;;  %v2872_v9 = vld [vmem:[#allocation2 + $0x488] ss:$16 sps:$4 sm:$0xff]  }
  0xe0   :  { %1595 = vmatprep.subr.bf16.mxu1 %v2832_v58  ;;  %2115 = vmatpush1.bf16.msra.mxu0 %v2917_v6  ;;  %v2877_v58 = vld [vmem:[#allocation2 + $0x4ac] ss:$16 sps:$4 sm:$0xff]   ;;  %v2887_v6 = vld [vmem:[#allocation2 + $0x528] ss:$16 sps:$4 sm:$0xff]  }
  0xe1   :  { %2116 = vmatprep.subr.bf16.mxu0 %v2922_v8  ;;  %v2958_v8 = vld [vmem:[#allocation6 + $0xf4] ss:$8 sps:$4 sm:$0xff]  }
  0xe3   :  { %1596 = vmatpush1.bf16.msra.mxu1 %v2830_v59  ;;  %v2875_v59 = vld [vmem:[#allocation2 + $0x4a8] ss:$16 sps:$4 sm:$0xff]  }
  0xe4   :  { %1597 = vmatprep.subr.bf16.mxu1 %v2835_v60  ;;  %2117 = vmatpush1.bf16.msra.mxu0 %v2920_v11  ;;  %v2880_v60 = vld [vmem:[#allocation2 + $0x4cc] ss:$16 sps:$4 sm:$0xff]   ;;  %v2890_v11 = vld [vmem:[#allocation2 + $0x548] ss:$16 sps:$4 sm:$0xff]  }
  0xe5   :  { %2118 = vmatprep.subr.bf16.mxu0 %v2925_v13  ;;  %v2961_v13 = vld [vmem:[#allocation6 + $0x104] ss:$8 sps:$4 sm:$0xff]  }
  0xe7   :  { %1598 = vmatpush1.bf16.msra.mxu1 %v2833_v0  ;;  %v2886_v0 = vld [vmem:[#allocation2 + $0x50c] ss:$16 sps:$4 sm:$0xff]  }
  0xe8   :  { %1599 = vmatprep.subr.bf16.mxu1 %v2838_v3  ;;  %2119 = vmatpush1.bf16.msra.mxu0 %v2923_v15  ;;  %v2889_v3 = vld [vmem:[#allocation2 + $0x52c] ss:$16 sps:$4 sm:$0xff]  }
  0xe9   :  { %2120 = vmatprep.subr.bf16.mxu0 %v2928_v17  ;;  %v2898_v15 = vld [vmem:[#allocation2 + $0x58c] ss:$16 sps:$4 sm:$0xff]  }
  0xea   :  { %v2901_v17 = vld [vmem:[#allocation2 + $0x5ac] ss:$16 sps:$4 sm:$0xff]  }
  0xeb   :  { %1600 = vmatpush1.bf16.msra.mxu1 %v2836_v5  ;;  %v2953_v5 = vld [vmem:[#allocation6 + $0xe0] ss:$8 sps:$4 sm:$0xff]  }
  0xec   :  { %1601 = vmatprep.subr.bf16.mxu1 %v2841_v7  ;;  %2121 = vmatpush1.bf16.msra.mxu0 %v2926_v19  ;;  %v2892_v7 = vld [vmem:[#allocation2 + $0x54c] ss:$16 sps:$4 sm:$0xff]  }
  0xed   :  { %2122 = vmatprep.subr.bf16.mxu0 %v2931_v21  ;;  %v2904_v19 = vld [vmem:[#allocation2 + $0x5cc] ss:$16 sps:$4 sm:$0xff]  }
  0xee   :  { %v2907_v21 = vld [vmem:[#allocation2 + $0x5ec] ss:$16 sps:$4 sm:$0xff]  }
  0xef   :  { %1602 = vmatpush1.bf16.msra.mxu1 %v2839_v10  ;;  %v2956_v10 = vld [vmem:[#allocation6 + $0xf0] ss:$8 sps:$4 sm:$0xff]  }
  0xf0   :  { %1603 = vmatprep.subr.bf16.mxu1 %v2844_v12  ;;  %2123 = vmatpush1.bf16.msra.mxu0 %v2929_v24  ;;  %v2895_v12 = vld [vmem:[#allocation2 + $0x56c] ss:$16 sps:$4 sm:$0xff]  }
  0xf1   :  { %2124 = vmatprep.subr.bf16.mxu0 %v2934_v27  ;;  %v2910_v24 = vld [vmem:[#allocation2 + $0x60c] ss:$16 sps:$4 sm:$0xff]  }
  0xf3   :  { %1604 = vmatpush1.bf16.msra.mxu1 %v2842_v14  ;;  %v2893_v14 = vld [vmem:[#allocation2 + $0x568] ss:$16 sps:$4 sm:$0xff]  }
  0xf4   :  { %1605 = vmatprep.subr.bf16.mxu1 %v2847_v16  ;;  %2125 = vmatpush1.bf16.msra.mxu0 %v2932_v29  ;;  %v2896_v16 = vld [vmem:[#allocation2 + $0x588] ss:$16 sps:$4 sm:$0xff]  }
  0xf5   :  { %2126 = vmatprep.subr.bf16.mxu0 %v2937_v31  ;;  %v376_v31 = vsub.s32 0, %v3204_v46 }
  0xf7   :  { %1606 = vmatpush1.bf16.msra.mxu1 %v2845_v18  ;;  %v2899_v18 = vld [vmem:[#allocation2 + $0x5a8] ss:$16 sps:$4 sm:$0xff]  }
  0xf8   :  { %1607 = vmatprep.subr.bf16.mxu1 %v2850_v20  ;;  %2127 = vmatpush1.bf16.msra.mxu0 %v2935_v33  ;;  %v2902_v20 = vld [vmem:[#allocation2 + $0x5c8] ss:$16 sps:$4 sm:$0xff]   ;;  %v380_v33 = vsub.s32 1, %v3204_v46 }
  0xf9   :  { %2128 = vmatprep.subr.bf16.mxu0 %v2940_v35 }
  0xfb   :  { %1608 = vmatpush1.bf16.msra.mxu1 %v2848_v23  ;;  %v2905_v23 = vld [vmem:[#allocation2 + $0x5e8] ss:$16 sps:$4 sm:$0xff]  }
  0xfc   :  { %1609 = vmatprep.subr.bf16.mxu1 %v2853_v26  ;;  %2129 = vmatpush1.bf16.msra.mxu0 %v2938_v37  ;;  %v2908_v26 = vld [vmem:[#allocation2 + $0x608] ss:$16 sps:$4 sm:$0xff]  }
  0xfd   :  { %2130 = vmatprep.subr.bf16.mxu0 %v2943_v41 }
  0xff   :  { %1610 = vmatpush1.bf16.msra.mxu1 %v2851_v28 }
 0x100   :  { %1611 = vmatprep.subr.bf16.mxu1 %v2856_v30  ;;  %2131 = vmatpush1.bf16.msra.mxu0 %v2941_v44 }
 0x101   :  { %2132 = vmatprep.subr.bf16.mxu0 %v2946_v45 }
 0x103   :  { %1612 = vmatpush1.bf16.msra.mxu1 %v2854_v32  ;;  %v3278_v32 = vld [vmem:[#allocation4] sm:$0xf] }
 0x104   :  { %1613 = vmatprep.subr.bf16.mxu1 %v2859_v34  ;;  %2133 = vmatpush1.bf16.msra.mxu0 %v2944_v50  ;;  %v2964_v50 = vld [vmem:[#allocation6 + $0x114] ss:$8 sps:$4 sm:$0xff]  }
 0x105   :  { %2134 = vmatprep.subr.bf16.mxu0 %v2949_v51  ;;  %v2962_v51 = vld [vmem:[#allocation6 + $0x110] ss:$8 sps:$4 sm:$0xff]  }
 0x107   :  { %1614 = vmatpush1.bf16.msra.mxu1 %v2857_v36 }
 0x108   :  { %1624 = vmatprep.subr.bf16.mxu1 %v2862_v38  ;;  %2135 = vmatpush1.bf16.msra.mxu0 %v2947_v56  ;;  %v2970_v56 = vld [vmem:[#allocation6 + $0x134] ss:$8 sps:$4 sm:$0xff]  }
 0x109   :  { %2136 = vmatprep.subr.bf16.mxu0 %v2952_v22  ;;  %v2968_v22 = vld [vmem:[#allocation6 + $0x130] ss:$8 sps:$4 sm:$0xff]  }
 0x10a   :  { %1616 = vmatmul.mubr.bf16.vlgmr.msra.gmra.mrb[4].mxu1 %v3230_v25  ;;  %v2869_v25 = vld [vmem:[#allocation2 + $0x468] ss:$16 sps:$4 sm:$0xff]  }
 0x10b   :  { %1625 = vmatpush1.bf16.msra.mxu1 %v2860_v42  ;;  %1656 = vmatprep.mubr.bf16.mxu1 %v3248_v1  ;;  %v2950_v1 = vld [vmem:[#allocation6 + $0xd0] ss:$8 sps:$4 sm:$0xff]  }
 0x10c   :  { %1626 = vmatprep.subr.bf16.mxu1 %v2865_v43  ;;  %2137 = vmatpush1.bf16.msra.mxu0 %v2950_v1  ;;  %v2976_v1 = vld [vmem:[#allocation6 + $0x154] ss:$8 sps:$4 sm:$0xff]  }
 0x10d   :  { %2138 = vmatprep.subr.bf16.mxu0 %v2955_v4  ;;  %v2989_v4 = vld [vmem:[#allocation6 + $0x1a0] ss:$8 sps:$4 sm:$0xff]  }
 0x10f   :  { %1627 = vmatpush1.bf16.msra.mxu1 %v2863_v47  ;;  %v2959_v47 = vld [vmem:[#allocation6 + $0x100] ss:$8 sps:$4 sm:$0xff]  }
 0x110   :  { %1628 = vmatprep.subr.bf16.mxu1 %v2868_v48  ;;  %2139 = vmatpush1.bf16.msra.mxu0 %v2953_v5  ;;  %v2994_v5 = vld [vmem:[#allocation6 + $0x1b4] ss:$8 sps:$4 sm:$0xff]  }
 0x111   :  { %2140 = vmatprep.subr.bf16.mxu0 %v2958_v8  ;;  %v2995_v8 = vld [vmem:[#allocation6 + $0x1c0] ss:$8 sps:$4 sm:$0xff]  }
 0x113   :  { %1629 = vmatpush1.bf16.msra.mxu1 %v2866_v52  ;;  %v2967_v52 = vld [vmem:[#allocation6 + $0x124] ss:$8 sps:$4 sm:$0xff]  }
 0x114   :  { %1630 = vmatprep.subr.bf16.mxu1 %v2871_v54  ;;  %2141 = vmatpush1.bf16.msra.mxu0 %v2956_v10  ;;  %v2965_v54 = vld [vmem:[#allocation6 + $0x120] ss:$8 sps:$4 sm:$0xff]   ;;  %v3000_v10 = vld [vmem:[#allocation6 + $0x1d4] ss:$8 sps:$4 sm:$0xff]  }
 0x115   :  { %2151 = vmatprep.subr.bf16.mxu0 %v2961_v13  ;;  %v3001_v13 = vld [vmem:[#allocation6 + $0x1e0] ss:$8 sps:$4 sm:$0xff]  }
 0x117   :  { %1631 = vmatpush1.bf16.msra.mxu1 %v2869_v25  ;;  %v2973_v25 = vld [vmem:[#allocation6 + $0x144] ss:$8 sps:$4 sm:$0xff]  }
 0x118   :  { %1632 = vmatprep.subr.bf16.mxu1 %v2874_v57  ;;  %v2971_v57 = vld [vmem:[#allocation6 + $0x140] ss:$8 sps:$4 sm:$0xff]  }
 0x11b   :  { %1633 = vmatpush1.bf16.msra.mxu1 %v2872_v9  ;;  %v2974_v9 = vld [vmem:[#allocation6 + $0x150] ss:$8 sps:$4 sm:$0xff]  }
 0x11c   :  { %1634 = vmatprep.subr.bf16.mxu1 %v2877_v58  ;;  %v2979_v58 = vld [vmem:[#allocation6 + $0x164] ss:$8 sps:$4 sm:$0xff]  }
 0x11f   :  { %1635 = vmatpush1.bf16.msra.mxu1 %v2875_v59  ;;  %v2977_v59 = vld [vmem:[#allocation6 + $0x160] ss:$8 sps:$4 sm:$0xff]  }
 0x120   :  { %1636 = vmatprep.subr.bf16.mxu1 %v2880_v60  ;;  %v2982_v60 = vld [vmem:[#allocation6 + $0x174] ss:$8 sps:$4 sm:$0xff]  }
 0x123   :  { %1637 = vmatpush1.bf16.msra.mxu1 %v2878_v61  ;;  %v2980_v61 = vld [vmem:[#allocation6 + $0x170] ss:$8 sps:$4 sm:$0xff]  }
 0x124   :  { %1638 = vmatprep.subr.bf16.mxu1 %v2883_v62  ;;  %v2985_v62 = vld [vmem:[#allocation6 + $0x184] ss:$8 sps:$4 sm:$0xff]  }
 0x127   :  { %1639 = vmatpush1.bf16.msra.mxu1 %v2881_v63  ;;  %v2983_v63 = vld [vmem:[#allocation6 + $0x180] ss:$8 sps:$4 sm:$0xff]  }
 0x128   :  { %1640 = vmatprep.subr.bf16.mxu1 %v2886_v0  ;;  %v2988_v0 = vld [vmem:[#allocation6 + $0x194] ss:$8 sps:$4 sm:$0xff]  }
 0x12b   :  { %1641 = vmatpush1.bf16.msra.mxu1 %v2884_v2  ;;  %v2986_v2 = vld [vmem:[#allocation6 + $0x190] ss:$8 sps:$4 sm:$0xff]  }
 0x12c   :  { %1642 = vmatprep.subr.bf16.mxu1 %v2889_v3  ;;  %v2991_v3 = vld [vmem:[#allocation6 + $0x1a4] ss:$8 sps:$4 sm:$0xff]  }
 0x12f   :  { %1643 = vmatpush1.bf16.msra.mxu1 %v2887_v6  ;;  %v2992_v6 = vld [vmem:[#allocation6 + $0x1b0] ss:$8 sps:$4 sm:$0xff]  }
 0x130   :  { %1644 = vmatprep.subr.bf16.mxu1 %v2892_v7  ;;  %v2997_v7 = vld [vmem:[#allocation6 + $0x1c4] ss:$8 sps:$4 sm:$0xff]  }
 0x133   :  { %1645 = vmatpush1.bf16.msra.mxu1 %v2890_v11  ;;  %v2998_v11 = vld [vmem:[#allocation6 + $0x1d0] ss:$8 sps:$4 sm:$0xff]  }
 0x134   :  { %1646 = vmatprep.subr.bf16.mxu1 %v2895_v12  ;;  %v3003_v12 = vld [vmem:[#allocation6 + $0x1e4] ss:$8 sps:$4 sm:$0xff]  }
 0x137   :  { %1647 = vmatpush1.bf16.msra.mxu1 %v2893_v14  ;;  %v3006_v14 = vld [vmem:[#allocation6 + $0x1f4] ss:$8 sps:$4 sm:$0xff]  }
 0x138   :  { %1648 = vmatprep.subr.bf16.mxu1 %v2898_v15  ;;  %v3004_v15 = vld [vmem:[#allocation6 + $0x1f0] ss:$8 sps:$4 sm:$0xff]  }
 0x13b   :  { %1649 = vmatpush1.bf16.msra.mxu1 %v2896_v16  ;;  %v384_v16 = vsub.s32 2, %v3204_v46 }
 0x13c   :  { %1650 = vmatprep.subr.bf16.mxu1 %v2901_v17  ;;  %v388_v17 = vsub.s32 3, %v3204_v46 }
 0x13f   :  { %1651 = vmatpush1.bf16.msra.mxu1 %v2899_v18  ;;  %v385_v18 = vrot.slane %v3278_v32, %v384_v16 }
 0x140   :  { %1652 = vmatprep.subr.bf16.mxu1 %v2904_v19  ;;  %v389_v19 = vrot.slane %v3278_v32, %v388_v17 }
 0x143   :  { %1653 = vmatpush1.bf16.msra.mxu1 %v2902_v20 }
 0x144   :  { %1654 = vmatprep.subr.bf16.mxu1 %v2907_v21 }
 0x147   :  { %1655 = vmatpush1.bf16.msra.mxu1 %v2905_v23 }
 0x148   :  { %1665 = vmatprep.subr.bf16.mxu1 %v2910_v24 }
 0x14a   :  { %1657 = vmatmul.mubr.bf16.vlgmr.msra.gmra.mrb[4].mxu1 %v3259_v39  ;;  %v377_v39 = vrot.slane %v3278_v32, %v376_v31 }
 0x14b   :  { %1666 = vmatpush1.bf16.msra.mxu1 %v2908_v26  ;;  %1697 = vmatprep.mubr.bf16.mxu1 %v3112_v49  ;;  %v381_v49 = vrot.slane %v3278_v32, %v380_v33 }
 0x156   :  { %2498 = vmatmul.mubr.msk.bf16.vlgmr.msra.gmra.mrb[4].mxu1 %vm1374_vm0, %v3267_v55 }
 0x15d   :  { %v1412_v27 = vpop.f32.mrb[0].mxu1 }
 0x15e   :  { %v1414_v28 = vpop.f32.mrb[1].mxu1  ;;  %v1413_v34 = vadd.f32 %v1412_v27, %v377_v39 }
 0x15f   :  { %v1416_v29 = vpop.f32.mrb[2].mxu1  ;;  %v1415_v55 = vadd.f32 %v1414_v28, %v381_v49  ;;  %v1778_v49 = vld [vmem:[#allocation7] sm:$0x3] }
 0x160   :  { %v1417_v30 = vpop.f32.mrb[3].mxu1 }
 0x1aa   :  { %v1535_v35 = vpop.f32.mrb[0].mxu0 }
 0x1ab   :  { %v2564_v36 = vadd.f32 %v1535_v35, %v1413_v34  ;;  %v1537_v37 = vpop.f32.mrb[1].mxu0  ;;  %v1787_v34 = vrot.slane %v1778_v49, %v380_v33  ;;  %v2202_v33 = vld [vmem:[%s3320_s5 + $0x2] sm:$0x1] }
 0x1ac   :  { %v2566_v38 = vadd.f32 %v1537_v37, %v1415_v55  ;;  %v1539_v41 = vpop.f32.mrb[2].mxu0 }
 0x1ad   :  { %v1706_v42 = vmax.f32 %v2564_v36, 0.0  ;;  %v1540_v43 = vpop.f32.mrb[3].mxu0 }
 0x1ae   :  { %v1707_v44 = vmax.f32 %v2566_v38, 0.0  ;;  %v2201_v43 = vld [vmem:[%s3320_s5 + $0x1] sm:$0x1] }
 0x1af   :  { %v1710_v48 = vpack.c.bf16 %v1706_v42, %v1706_v42  ;;  %v2200_v42 = vld [vmem:[%s3320_s5] sm:$0x1] }
 0x1b0   :  { %v1711_v45 = vpack.c.bf16 %v1707_v44, %v1707_v44 }
 0x1b2   :  { %2142 = vmatprep.mubr.bf16.mxu0 %v1711_v45  ;;  %v2203_v45 = vld [vmem:[%s3320_s5 + $0x3] sm:$0x1] }
 0x1b3   :  { %2143 = vmatmul.mubr.bf16.vlgmr.msra.gmra.mrb[4].mxu0 %v1710_v48  ;;  %v2205_v48 = vunpack.c.l.bf16 %v2201_v43 }
 0x1b4   :  { %2152 = vmatpush1.bf16.msra.mxu0 %v2959_v47  ;;  %v2204_v47 = vunpack.c.l.bf16 %v2200_v42 }
 0x1b5   :  { %2153 = vmatprep.subr.bf16.mxu0 %v2964_v50 }
 0x1b8   :  { %2154 = vmatpush1.bf16.msra.mxu0 %v2962_v51 }
 0x1b9   :  { %2155 = vmatprep.subr.bf16.mxu0 %v2967_v52  ;;  %v2206_v52 = vunpack.c.l.bf16 %v2202_v33 }
 0x1bc   :  { %2156 = vmatpush1.bf16.msra.mxu0 %v2965_v54  ;;  %v2207_v54 = vunpack.c.l.bf16 %v2203_v45 }
 0x1bd   :  { %2157 = vmatprep.subr.bf16.mxu0 %v2970_v56 }
 0x1c0   :  { %2158 = vmatpush1.bf16.msra.mxu0 %v2968_v22 }
 0x1c1   :  { %2159 = vmatprep.subr.bf16.mxu0 %v2973_v25 }
 0x1c4   :  { %2160 = vmatpush1.bf16.msra.mxu0 %v2971_v57 }
 0x1c5   :  { %2161 = vmatprep.subr.bf16.mxu0 %v2976_v1 }
 0x1c8   :  { %2162 = vmatpush1.bf16.msra.mxu0 %v2974_v9  ;;  %v2193_v9 = vand.u32 127, %v98_v40 }
 0x1c9   :  { %2163 = vmatprep.subr.bf16.mxu0 %v2979_v58 }
 0x1ca   :  { %vm2194_vm1 = vcmp.ge.s32.totalorder %v2193_v9, 32  ;;  %vm2195_vm2 = vcmp.lt.s32.totalorder %v2193_v9, 52 }
 0x1cb   :  { %vm2196_vm3 = vmand %vm2194_vm1, %vm2195_vm2 }
 0x1cc   :  { %2164 = vmatpush1.bf16.msra.mxu0 %v2977_v59 }
 0x1cd   :  { %2165 = vmatprep.subr.bf16.mxu0 %v2982_v60 }
 0x1d0   :  { %2166 = vmatpush1.bf16.msra.mxu0 %v2980_v61  ;;  %v1783_v61 = vrot.slane %v1778_v49, %v376_v31 }
 0x1d1   :  { %2167 = vmatprep.subr.bf16.mxu0 %v2985_v62 }
 0x1d4   :  { %2168 = vmatpush1.bf16.msra.mxu0 %v2983_v63 }
 0x1d5   :  { %2169 = vmatprep.subr.bf16.mxu0 %v2988_v0 }
 0x1d8   :  { %2170 = vmatpush1.bf16.msra.mxu0 %v2986_v2 }
 0x1d9   :  { %2171 = vmatprep.subr.bf16.mxu0 %v2991_v3 }
 0x1dc   :  { %2172 = vmatpush1.bf16.msra.mxu0 %v2989_v4 }
 0x1dd   :  { %2173 = vmatprep.subr.bf16.mxu0 %v2994_v5 }
 0x1e0   :  { %2174 = vmatpush1.bf16.msra.mxu0 %v2992_v6 }
 0x1e1   :  { %2175 = vmatprep.subr.bf16.mxu0 %v2997_v7 }
 0x1e4   :  { %2176 = vmatpush1.bf16.msra.mxu0 %v2995_v8 }
 0x1e5   :  { %2177 = vmatprep.subr.bf16.mxu0 %v3000_v10 }
 0x1e8   :  { %2178 = vmatpush1.bf16.msra.mxu0 %v2998_v11 }
 0x1e9   :  { %2179 = vmatprep.subr.bf16.mxu0 %v3003_v12 }
 0x1ec   :  { %2180 = vmatpush1.bf16.msra.mxu0 %v3001_v13 }
 0x1ed   :  { %2181 = vmatprep.subr.bf16.mxu0 %v3006_v14 }
 0x1f0   :  { %2182 = vmatpush1.bf16.msra.mxu0 %v3004_v15 }
 0x229   :  { %v1699_v20 = vpop.f32.mrb[4].mxu1 }
 0x22a   :  { %v2567_v21 = vadd.f32 %v1699_v20, %v385_v18  ;;  %v1701_v23 = vpop.f32.mrb[5].mxu1 }
 0x22b   :  { %v2568_v24 = vadd.f32 %v1701_v23, %v389_v19  ;;  %v1703_v26 = vpop.f32.mrb[6].mxu1 }
 0x22c   :  { %v1708_v27 = vmax.f32 %v2567_v21, 0.0  ;;  %v1704_v28 = vpop.f32.mrb[7].mxu1 }
 0x22d   :  { %v1709_v29 = vmax.f32 %v2568_v24, 0.0 }
 0x22e   :  { %v1712_v39 = vpack.c.bf16 %v1708_v27, %v1708_v27 }
 0x22f   :  { %v1713_v30 = vpack.c.bf16 %v1709_v29, %v1709_v29 }
 0x231   :  { %2183 = vmatprep.mubr.bf16.mxu0 %v1713_v30 }
 0x232   :  { %2184 = vmatmul.mubr.bf16.vlgmr.msra.gmra.mrb[4].mxu0 %v1712_v39 }
 0x305   :  { %v2185_v55 = vpop.f32.mrb[4].mxu0 }
 0x306   :  { %v2187_v35 = vpop.f32.mrb[5].mxu0  ;;  %v2569_v2 = vadd.f32 %v2185_v55, %v1783_v61 }
 0x307   :  { %v2570_v36 = vadd.f32 %v2187_v35, %v1787_v34  ;;  %v2189_v32 = vpop.f32.mrb[6].mxu0 }
 0x308   :  { %v2190_v37 = vpop.f32.mrb[7].mxu0 }
 0x309   :  { %v2197_v38 = vmul.f32 0.5, %v2570_v36 }
 0x30b   :  { %v2198_v41 = vmul.f32 1.442695, %v2197_v38 }
 0x30d   :  { %3007 = vpow2.f32 %v2198_v41 }
 0x317   :  { %v3008_v44 = vpop.eup %3007 }
 0x318   :  { %v2209_v50 = vcombine.high %v3008_v44, %v3008_v44  ;;  %v2216_v51 = vrot.slane %v3008_v44, %v3207_v53 }
 0x31a   :  { %v2223_v56 = vrot.slane %v2209_v50, %v3207_v53  ;;  %v2224_v22 = vcombine.high %v2216_v51, %v2216_v51  ;;  %v2230_v57 = vmul.f32 %v2216_v51, %v2204_v47 }
 0x31c   :  { %v2225_v25 = vcombine.high %v2223_v56, %v2223_v56  ;;  %v2231_v1 = vmul.f32 %v2224_v22, %v2205_v48  ;;  %v2232_v58 = vmul.f32 %v2223_v56, %v2206_v52 }
 0x31e   :  { %v2233_v59 = vmul.f32 %v2225_v25, %v2207_v54  ;;  %v2238_v60 = vcombine.low %v2230_v57, %v2231_v1 }
 0x320   :  { %v2239_v62 = vcombine.low %v2232_v58, %v2233_v59  ;;  %v2246_v63 = vrot.slane %v2238_v60, %v3207_v53 }
 0x322   :  { %v2253_v0 = vrot.slane %v2239_v62, %v3207_v53 }
 0x324   :  { %v2254_v3 = vcombine.low %v2246_v63, %v2253_v0 }
 0x326   :  { %v2256_v4 = vadd.f32 %v2569_v2, %v2254_v3 }
 0x328   :  { %v2257_v5 = vsel %vm2196_vm3, %v2256_v4, %v2569_v2 }
 0x329   :  { %2258 = vst [vmem:[#allocation9] sm:$0xff] %v2257_v5 }
 0x330   :  { %v2276_v40 = vld [vmem:[#allocation9] sm:$0x3] }
 0x331   :  { %2277 = vst [vmem:[%s3321_s6] sm:$0x3] %v2276_v40 }
 0x332   :  { %2294 = vsyncpa [#allocation3], 1 }
 0x333   :  { %2295 = vsyncpa [#allocation5], 1 }
 0x334   :  { %2296 = vsyncpa [#allocation8], 1 }

</bundles_post_ra>
